<compile_context>
chip_gen: v7x
topology: tpu7x:2x2x1
jax: 0.10.0
libtpu: 0.0.40
codegen_flags: <defaults>
</compile_context>

<pallas_src>
import functools

import jax
import jax.numpy as jnp
from jax.experimental import pallas as pl
from jax.experimental.pallas import tpu as pltpu


_VMEM_LIMIT_BYTES = 32 << 20    # requested scoped-VMEM limit (safe on v5e/v6e/v7x)
_PIPE_BUDGET_BYTES = 20 << 20   # 2 x (in_tile + out_tile) kept under this
_TARGET_IN_BYTES = 6 << 20      # aim ~6 MiB of input bytes per grid step
_RESIDENT_MAX_BYTES = 6 << 20   # max VMEM for VMEM-resident scale/bias (x2 buffers)


def _make_kernel(rows, nr, resident):
    """Kernel factory: `rows` static; resident scale/bias are sliced per block."""
    if (not resident) or nr == 1:
        # scale/bias refs already match the x row-block (or the whole thing).
        def kernel(scale_ref, bias_ref, x_ref, o_ref):
            x = x_ref[...].astype(jnp.float32)
            o_ref[...] = (x * scale_ref[...] + bias_ref[...]).astype(o_ref.dtype)
    else:
        def kernel(scale_ref, bias_ref, x_ref, o_ref):
            # scale/bias are VMEM-resident (R_pad, 1); slice this block's rows.
            r0 = pl.multiple_of(pl.program_id(0) * rows, 8)
            s = scale_ref[pl.ds(r0, rows), :]
            b = bias_ref[pl.ds(r0, rows), :]
            x = x_ref[...].astype(jnp.float32)
            o_ref[...] = (x * s + b).astype(o_ref.dtype)
    return kernel


def _choose_blocks(R, L, in_itemsize, out_itemsize):
    """Pick (rows, cols, sub) row/col block sizes for the (R, L) view."""
    sub = max(8, 32 // min(in_itemsize, out_itemsize))  # dtype-native sublane multiple
    lane = 128

    # Max elements per step so that 2 x (in_tile + out_tile) fits the budget,
    # also capped by the ~6 MiB-of-input target.
    tile_cap = max(
        sub * lane,
        min(_PIPE_BUDGET_BYTES // (2 * (in_itemsize + out_itemsize)),
            _TARGET_IN_BYTES // in_itemsize),
    )

    # Column (lane) block: multiple of 128, or the full extent when H*W is not
    # 128-aligned (block == full dim satisfies the tiling rule).
    if L % lane == 0:
        rows_min = min(sub, R)
        cols = min(L, max(lane, ((tile_cap // max(rows_min, 1)) // lane) * lane))
    else:
        # TODO(synk): pad/reshape non-128-multiple H*W for fully unmasked stores.
        cols = L

    # Row (sublane) block: multiple of `sub`, or the full extent R.
    rows = (max(1, tile_cap // cols) // sub) * sub
    if rows < sub:
        rows = sub              # hard 8-aligned floor (pathological huge-L case)
    if rows >= R:
        rows = R                # full extent is always a legal block dim

    total_bytes = R * L * (in_itemsize + out_itemsize)

    # Keep >= 2 grid steps when there is non-trivial work (pipelining overlap
    # and megacore sharding on v7x).
    if pl.cdiv(R, rows) * pl.cdiv(L, cols) == 1 and total_bytes > (2 << 20):
        if R >= 2 * sub:
            rows = max(sub, (pl.cdiv(R, 2) // sub) * sub)
        elif L % lane == 0 and L >= 2 * lane:
            cols = max(lane, ((L // 2) // lane) * lane)

    # v7x nicety: prefer an even number of row blocks for clean 2-TC sharding.
    nr = pl.cdiv(R, rows)
    if nr > 1 and nr % 2 == 1 and rows - sub >= sub and total_bytes > (8 << 20):
        cand = rows - sub
        if pl.cdiv(R, cand) % 2 == 0:
            rows = cand

    return rows, cols, sub


def normalize(x, mean, std, *, out_dtype=None):
    """(x - mean[None, :, None, None]) / std[None, :, None, None] for NCHW x."""
    N, C, H, W = x.shape
    L = H * W
    R = N * C

    if out_dtype is None:
        out_dtype = x.dtype if jnp.issubdtype(x.dtype, jnp.floating) else jnp.float32
    out_dtype = jnp.dtype(out_dtype)
    if not jnp.issubdtype(out_dtype, jnp.floating):
        raise ValueError("normalize: out_dtype must be a floating dtype, got "
                         f"{out_dtype}")

    in_itemsize = jnp.dtype(x.dtype).itemsize
    out_itemsize = out_dtype.itemsize
    rows, cols, _ = _choose_blocks(R, L, in_itemsize, out_itemsize)

    nr = pl.cdiv(R, rows)
    nc = pl.cdiv(L, cols)
    R_pad = nr * rows  # pad scale/bias so in-kernel row slices never go OOB

    # Fold the divide into a multiply-add, kept in f32 regardless of x dtype.
    mean = jnp.asarray(mean, jnp.float32)
    std = jnp.asarray(std, jnp.float32)
    scale_c = 1.0 / std                       # (C,)
    bias_c = -mean * scale_c                  # (C,)
    scale_r = jnp.tile(scale_c, N)            # row r = n*C + c
    bias_r = jnp.tile(bias_c, N)
    if R_pad > R:
        scale_r = jnp.pad(scale_r, (0, R_pad - R))
        bias_r = jnp.pad(bias_r, (0, R_pad - R))
    scale = scale_r.reshape(R_pad, 1)
    bias = bias_r.reshape(R_pad, 1)

    # Keep scale/bias fully VMEM-resident (fetched once) unless N*C is huge.
    resident_bytes = 2 * 2 * (pl.cdiv(R_pad, 8) * 8) * 128 * 4
    resident = resident_bytes <= _RESIDENT_MAX_BYTES
    if resident:
        sb_spec = pl.BlockSpec((R_pad, 1), lambda i, j: (0, 0))
    else:
        sb_spec = pl.BlockSpec((rows, 1), lambda i, j: (i, 0))

    # Free, contiguous reshape: NCHW -> (N*C, H*W) so H*W is the lane dim.
    x2 = x.reshape(R, L)

    out2 = pl.pallas_call(
        _make_kernel(rows, nr, resident),
        out_shape=jax.ShapeDtypeStruct((R, L), out_dtype),
        grid_spec=pltpu.PrefetchScalarGridSpec(
            num_scalar_prefetch=0,
            grid=(nr, nc),
            in_specs=[
                sb_spec,                                          # scale
                sb_spec,                                          # bias
                pl.BlockSpec((rows, cols), lambda i, j: (i, j)),  # x
            ],
            out_specs=pl.BlockSpec((rows, cols), lambda i, j: (i, j)),
        ),
        compiler_params=pltpu.CompilerParams(
            dimension_semantics=("parallel", "parallel"),
            vmem_limit_bytes=_VMEM_LIMIT_BYTES,
        ),
    )(scale, bias, x2)

    return out2.reshape(N, C, H, W)


if __name__ == "__main__":
    key = jax.random.PRNGKey(0)

    def run_case(k, shape, mean, std):
        x = jax.random.uniform(k, shape, dtype=jnp.float32)
        out = jax.block_until_ready(normalize(x, mean, std))
        ref = (x - mean[None, :, None, None]) / std[None, :, None, None]
        assert out.shape == x.shape
        assert out.dtype == x.dtype
        # scale/bias folding reorders f32 rounding by a few ulps vs (x-m)/s.
        assert jnp.allclose(out, ref, atol=1e-5, rtol=1e-5)

    mean4 = jnp.array([0.4914, 0.4822, 0.4465, 0.5000], dtype=jnp.float32)
    std4 = jnp.array([0.2471, 0.2435, 0.2616, 0.2500], dtype=jnp.float32)
    mean3, std3 = mean4[:3], std4[:3]

    k1, k2, k3 = jax.random.split(key, 3)
    run_case(k1, (2, 4, 16, 16), mean4, std4)   # primary small demo shape
    run_case(k2, (2, 3, 32, 32), mean3, std3)   # R = N*C not a multiple of 8
    run_case(k3, (2, 3, 10, 10), mean3, std3)   # H*W not 128-aligned

    print("KERNEL_OK")
</pallas_src>

<mosaic_0001>
module attributes {stable_mosaic.version = 11 : i64} {
  func.func @kernel(%arg0: i32, %arg1: i32, %arg2: memref<8x1xf32, #tpu.memory_space<vmem>>, %arg3: memref<8x1xf32, #tpu.memory_space<vmem>>, %arg4: memref<8x256xf32, #tpu.memory_space<vmem>>, %arg5: memref<8x256xf32, #tpu.memory_space<vmem>>) attributes {dimension_semantics = [#tpu.dimension_semantics<parallel>, #tpu.dimension_semantics<parallel>], iteration_bounds = array<i64: 1, 1>, scalar_prefetch = 0 : i64, scratch_operands = 0 : i64, tpu.core_type = #tpu.core_type<tc>, window_params = [{pipeline_mode = #tpu.pipeline_mode<synchronous>, transform_indices = @transform_0, window_bounds = array<i64: 8, 1>}, {pipeline_mode = #tpu.pipeline_mode<synchronous>, transform_indices = @transform_1, window_bounds = array<i64: 8, 1>}, {transform_indices = @transform_2, window_bounds = array<i64: 8, 256>}, {transform_indices = @transform_3, window_bounds = array<i64: 8, 256>}]} {
    %c0 = arith.constant 0 : index
    %c0_0 = arith.constant 0 : index
    %0 = vector.load %arg4[%c0, %c0_0] : memref<8x256xf32, #tpu.memory_space<vmem>>, vector<8x256xf32>
    %c0_1 = arith.constant 0 : index
    %c0_2 = arith.constant 0 : index
    %1 = vector.load %arg2[%c0_1, %c0_2] : memref<8x1xf32, #tpu.memory_space<vmem>>, vector<8x1xf32>
    %2 = vector.broadcast %1 : vector<8x1xf32> to vector<8x256xf32>
    %3 = arith.mulf %0, %2 : vector<8x256xf32>
    %c0_3 = arith.constant 0 : index
    %c0_4 = arith.constant 0 : index
    %4 = vector.load %arg3[%c0_3, %c0_4] : memref<8x1xf32, #tpu.memory_space<vmem>>, vector<8x1xf32>
    %5 = vector.broadcast %4 : vector<8x1xf32> to vector<8x256xf32>
    %6 = arith.addf %3, %5 : vector<8x256xf32>
    %c0_5 = arith.constant 0 : index
    %c0_6 = arith.constant 0 : index
    %7 = vector.load %arg5[%c0_5, %c0_6] : memref<8x256xf32, #tpu.memory_space<vmem>>, vector<8x256xf32>
    tpu.vector_store %arg5[%c0_5, %c0_6], %6 {strides = array<i32>} : memref<8x256xf32, #tpu.memory_space<vmem>>, vector<8x256xf32>,
    return
  }
  func.func @transform_0(%arg0: i32, %arg1: i32) -> (i32, i32) {
    %c0_i32 = arith.constant 0 : i32
    %c0_i32_0 = arith.constant 0 : i32
    %c0_i32_1 = arith.constant 0 : i32
    return %c0_i32, %c0_i32_0 : i32, i32
  }
  func.func @transform_1(%arg0: i32, %arg1: i32) -> (i32, i32) {
    %c0_i32 = arith.constant 0 : i32
    %c0_i32_0 = arith.constant 0 : i32
    %c0_i32_1 = arith.constant 0 : i32
    return %c0_i32, %c0_i32_0 : i32, i32
  }
  func.func @transform_2(%arg0: i32, %arg1: i32) -> (i32, i32) {
    %c0_i32 = arith.constant 0 : i32
    return %arg0, %arg1 : i32, i32
  }
  func.func @transform_3(%arg0: i32, %arg1: i32) -> (i32, i32) {
    %c0_i32 = arith.constant 0 : i32
    return %arg0, %arg1 : i32, i32
  }
}

</mosaic_0001>

<bundles_post_ra>
// kernel: tpu_custom_call.1
= control target key start
LH: loop header
LB: loop body
LE: loop exit
PB: predicated region body
PF: predicated region fallthrough
CT: control target
= control target key end

     0   :  { %s122_s0 = inlined_call_operand.vmem [shape: f32[8,1], index: 0, kind: input, shape index: {}]   ;;  %s123_s1 = inlined_call_operand.vmem [shape: f32[8,1], index: 1, kind: input, shape index: {}]   ;;  %s124_s2 = inlined_call_operand.vmem [shape: f32[8,256], index: 2, kind: input, shape index: {}]   ;;  %s125_s3 = inlined_call_operand.hbm [shape: f32[8,256], index: 3, kind: output, shape index: {}]  }
   0x1   :  { %v17_v0 = vld [vmem:[%s122_s0] sm:$0xff] }
   0x2   :  { %8 = vsyncpa [#allocation3], 0  ;;  %v76_v1 = vmov 0   ;;  %v25_v2 = vld [vmem:[%s123_s1] sm:$0xff]  ;;  %v16_v5 = vld [vmem:[%s124_s2 + $0x8] sm:$0xff]  ;;  %s77_s20 = smov [#allocation2]  }
   0x3   :  { %51 = vset.pattern.permute.xlu0 %v76_v1  ;;  %v15_v4 = vld [vmem:[%s124_s2] sm:$0xff]  ;;  %s41_s0 = sshll.u32 %s77_s20, 4  ;;  %s42_s0 = int_to_ptr.vmem [resolvable:$true] %s41_s0 }
   0x4   :  { %20 = vperm.xlu0 %51, %v17_v0   ;;  %s52_s1 = scalar_lea.vmem %s42_s0, 256  ;;  %p57_p1 = scmp.lt.s32.totalorder %s42_s0, %s42_s0 }
   0x5   :  { %p53_p0 = scmp.ne.s32.totalorder %s42_s0, %s52_s1  ;;  %p58_p2 = scmp.lt.s32.totalorder %s52_s1, %s52_s1 }
   0x7   :  { %p59_p3 = por %p58_p2, %p57_p1 }
   0x8   :  { %28 = vperm.xlu0 %51, %v25_v2  }
   0x9   :  { %p60_p4 = pnand %p59_p3, %p53_p0 }
  0x83   :  { %v21_v3 = vpop.permute.xlu0 %20 }
  0x84   :  { %v23_v6 = vmul.f32 %v21_v3, %v15_v4  ;;  %v24_v7 = vmul.f32 %v21_v3, %v16_v5 }
  0x87   :  { %v29_v8 = vpop.permute.xlu0 %28 }
  0x88   :  { %v31_v9 = vadd.f32 %v29_v8, %v23_v6  ;;  %v32_v10 = vadd.f32 %v29_v8, %v24_v7 }
  0x8a   :  { %33 = vst [vmem:[#allocation2] sm:$0xff] %v31_v9  ;;  %34 = vst [vmem:[#allocation2 + $0x8] sm:$0xff] %v32_v10 }
  0x8b   :  { %63 = shalt.err (!%p60_p4)
}
  0x8c   :  { %s64_s2 = scalar_lea.hbm %s125_s3, 256 }
  0x8d   :  { %p65_p5 = scmp.ne.s32.totalorder %s125_s3, %s64_s2  ;;  %p68_p6 = scmp.lt.u32.totalorder %s64_s2, %s125_s3 }
  0x8f   :  { %p70_p7 = pnand %p68_p6, %p65_p5 }
  0x91   :  { %73 = shalt.err (!%p70_p7)
}
  0x92   :  { %44 = dma.vmem_to_hbm [thread:$0]  %s42_s0, 256, %s125_s3, [#allocation3]  }
  0x93   :  { %74 = dma.done.wait [#allocation3], 256  }
  0x94   :  { %75 = vsyncadd [#allocation3], 4294967040 }
  0x95   :  { %48 = vsyncpa [#allocation3], 1 }

</bundles_post_ra>
